<compile_context>
chip_gen: v6e
topology: v6e:2x2x1
jax: 0.10.0
libtpu: 0.0.40
codegen_flags: <defaults>
</compile_context>

<pallas_src>
import functools

import jax
import jax.numpy as jnp
from jax.experimental import pallas as pl
from jax.experimental.pallas import tpu as pltpu

_LANE = 128


def _soft_dice_partials_kernel(x_ref, t_ref, out_ref, *, hw_true, num_channels,
                               two_channel, ragged):
    # x_ref:   (tile_n, C, tile_rows, 128) logits, native dtype
    # t_ref:   (tile_n, tile_rows, 128)    targets, native dtype
    # out_ref: (3, acc_rows, 128) f32 per-batch-block partials:
    #          [0] = sum(p*t), [1] = sum(p), [2] = sum(t)
    s = pl.program_id(1)
    tile_n, _, tile_rows, lanes = x_ref.shape
    acc_rows = out_ref.shape[1]

    # Fresh output block for this batch block: zero at its first row tile.
    @pl.when(s == 0)
    def _():
        out_ref[...] = jnp.zeros_like(out_ref)

    # Mask for the ragged tail (last row tile and/or lane padding): positions
    # with flat spatial index >= hw_true contribute nothing. jnp.where (select)
    # is used so garbage/NaN from out-of-bounds rows never propagates.
    if ragged:
        r_idx = jax.lax.broadcasted_iota(jnp.int32, (tile_rows, lanes), 0)
        l_idx = jax.lax.broadcasted_iota(jnp.int32, (tile_rows, lanes), 1)
        pos = (s * tile_rows + r_idx) * lanes + l_idx
        valid = pos < hw_true
    else:
        valid = None

    def fold(v):
        # (tile_rows, 128) -> (acc_rows, 128): layout-preserving reshape + vreg
        # adds (acc_rows divides tile_rows by construction); no XLU reduce.
        return v.reshape(-1, acc_rows, lanes).sum(axis=0)

    pt_acc = jnp.zeros((acc_rows, lanes), jnp.float32)
    p_acc = jnp.zeros((acc_rows, lanes), jnp.float32)
    t_acc = jnp.zeros((acc_rows, lanes), jnp.float32)

    for n in range(tile_n):
        t = t_ref[n].astype(jnp.float32)
        if two_channel:
            # softmax(x, axis=C)[1] == sigmoid(x1 - x0): one transcendental/elem.
            p = jax.nn.sigmoid(x_ref[n, 1].astype(jnp.float32)
                               - x_ref[n, 0].astype(jnp.float32))
        else:
            # Incremental softmax: running max + running denominator; only
            # exp(x1 - m) stays live (low vreg pressure for large C).
            m = x_ref[n, 0].astype(jnp.float32)
            for c in range(1, num_channels):
                m = jnp.maximum(m, x_ref[n, c].astype(jnp.float32))
            num = jnp.exp(x_ref[n, 1].astype(jnp.float32) - m)
            den = num
            for c in range(num_channels):
                if c == 1:
                    continue
                den = den + jnp.exp(x_ref[n, c].astype(jnp.float32) - m)
            p = num * pl.reciprocal(den, approx=False)
        if valid is not None:
            p = jnp.where(valid, p, 0.0)
            t = jnp.where(valid, t, 0.0)
        pt_acc = pt_acc + fold(p * t)
        p_acc = p_acc + fold(p)
        t_acc = t_acc + fold(t)

    out_ref[0] += pt_acc
    out_ref[1] += p_acc
    out_ref[2] += t_acc


def _vmem_capacity_bytes():
    try:
        info = pltpu.get_tpu_info()
        cap = int(getattr(info, "vmem_capacity_bytes", 0))
        if cap > 0:
            return cap
    except Exception:
        pass
    return 64 << 20  # conservative default (v7x-sized VMEM)


def _choose_tiling(n, c, rows, x_itemsize, t_itemsize, budget_bytes,
                   target_rows=4096):
    """Pick (tile_n, tile_rows) so the double-buffered x+t working set stays
    under budget_bytes. tile_n always divides n; tile_rows is a multiple of 8
    unless it equals the full row extent (both legal block shapes)."""
    bytes_per_row = _LANE * (c * x_itemsize + t_itemsize)
    budget_rows = max(8, budget_bytes // (2 * bytes_per_row))
    if rows <= min(budget_rows, target_rows):
        # Whole per-batch spatial extent fits: block batch elements to amortize
        # the per-grid-step overhead on small images.
        tile_rows = rows
        cap_n = max(1, min(budget_rows // rows, target_rows // rows))
        tile_n = 1
        for d in range(1, n + 1):
            if n % d == 0 and d <= cap_n:
                tile_n = d
        return tile_n, tile_rows
    tile_rows = min(budget_rows, target_rows, rows)
    tile_rows = max(8, tile_rows - tile_rows % 8)
    return 1, tile_rows


def soft_dice_loss(inputs, targets, smooth=1.0):
    """inputs: (N, C, H, W) logits (C >= 2); targets: (N, H, W) mask -> scalar."""
    n, c, h, w = inputs.shape
    hw_true = h * w
    x = inputs.reshape(n, c, hw_true)
    t = targets.reshape(n, hw_true)

    pad = (-hw_true) % _LANE
    if pad:
        # Rare path (H*W not a multiple of 128); padded tail masked in-kernel.
        x = jnp.pad(x, ((0, 0), (0, 0), (0, pad)))
        t = jnp.pad(t, ((0, 0), (0, pad)))
    rows = (hw_true + pad) // _LANE
    x = x.reshape(n, c, rows, _LANE)      # lane-dense spatial, channel leading
    t = t.reshape(n, rows, _LANE)

    # Generation-aware VMEM budget for the double-buffered input stream.
    vmem_cap = _vmem_capacity_bytes()
    budget = min(vmem_cap // 3, 48 << 20)
    tile_n, tile_rows = _choose_tiling(n, c, rows, x.dtype.itemsize,
                                       t.dtype.itemsize, budget)
    acc_rows = 8 if tile_rows % 8 == 0 else tile_rows
    num_batch_blocks = n // tile_n
    num_row_tiles = pl.cdiv(rows, tile_rows)
    ragged = (rows % tile_rows != 0) or (rows * _LANE != hw_true)
    grid = (num_batch_blocks, num_row_tiles)

    kernel = functools.partial(
        _soft_dice_partials_kernel,
        hw_true=hw_true, num_channels=c, two_channel=(c == 2), ragged=ragged)

    tile_bytes = tile_n * tile_rows * _LANE * (
        c * x.dtype.itemsize + t.dtype.itemsize)
    out_bytes = num_batch_blocks * 3 * acc_rows * _LANE * 4
    vmem_limit = max(32 << 20, 2 * tile_bytes + (8 << 20))
    vmem_limit = int(min(vmem_limit, vmem_cap - (4 << 20)))

    cost = pl.CostEstimate(
        flops=int(n * hw_true * (3 * c + 6)),
        transcendentals=int(n * hw_true * (1 if c == 2 else c)),
        bytes_accessed=int(x.size * x.dtype.itemsize
                           + t.size * t.dtype.itemsize + out_bytes),
    )

    partials = pl.pallas_call(
        kernel,
        out_shape=jax.ShapeDtypeStruct(
            (num_batch_blocks, 3, acc_rows, _LANE), jnp.float32),
        grid_spec=pltpu.PrefetchScalarGridSpec(
            num_scalar_prefetch=0,
            grid=grid,
            in_specs=[
                pl.BlockSpec((tile_n, c, tile_rows, _LANE),
                             lambda nb, s: (nb, 0, s, 0)),
                pl.BlockSpec((tile_n, tile_rows, _LANE),
                             lambda nb, s: (nb, s, 0)),
            ],
            # Same output block across the row-tile axis -> resident accumulator.
            out_specs=pl.BlockSpec((None, 3, acc_rows, _LANE),
                                   lambda nb, s: (nb, 0, 0, 0)),
        ),
        compiler_params=pltpu.CompilerParams(
            # Batch-block axis is independent -> "parallel" (v7x megacore split);
            # the row-tile axis carries the per-batch-block accumulator.
            dimension_semantics=("parallel", "arbitrary"),
            vmem_limit_bytes=vmem_limit,
        ),
        cost_estimate=cost,
    )(x, t)

    # Tiny final reduce + dice formula in plain JAX (keeps kernel megacore-able).
    intersection = jnp.sum(partials[:, 0])
    sum_p = jnp.sum(partials[:, 1])
    sum_t = jnp.sum(partials[:, 2])
    score = 2.0 * (intersection + smooth) / (sum_p + sum_t + smooth)
    return 1.0 - score


def _reference(inputs, targets, smooth=1.0):
    # Pure-JAX mirror of the PyTorch SoftDiceLoss.forward (correctness check).
    p = jax.nn.softmax(inputs, axis=1)[:, 1, :, :]
    p = p.reshape(-1)
    t = targets.reshape(-1)
    intersection = jnp.sum(p * t)
    score = 2.0 * (intersection + smooth) / (jnp.sum(p) + jnp.sum(t) + smooth)
    return 1.0 - score


if __name__ == "__main__":
    key = jax.random.PRNGKey(0)
    k1, k2 = jax.random.split(key)

    N, C, H, W = 2, 4, 16, 16
    inputs = jax.random.normal(k1, (N, C, H, W), dtype=jnp.float32)
    targets = (jax.random.uniform(k2, (N, H, W)) > 0.5).astype(jnp.float32)

    loss = soft_dice_loss(inputs, targets)
    loss = jax.block_until_ready(loss)

    ref = _reference(inputs, targets)
    assert jnp.allclose(loss, ref, rtol=1e-5, atol=1e-5), (loss, ref)

    print("KERNEL_OK")
</pallas_src>

<mosaic_0001>
module attributes {stable_mosaic.version = 11 : i64} {
  func.func @_soft_dice_partials_kernel(%arg0: i32, %arg1: i32, %arg2: memref<2x4x2x128xf32, #tpu.memory_space<vmem>>, %arg3: memref<2x2x128xf32, #tpu.memory_space<vmem>>, %arg4: memref<1x3x2x128xf32, #tpu.memory_space<vmem>>) attributes {dimension_semantics = [#tpu.dimension_semantics<parallel>, #tpu.dimension_semantics<arbitrary>], iteration_bounds = array<i64: 1, 1>, scalar_prefetch = 0 : i64, scratch_operands = 0 : i64, tpu.core_type = #tpu.core_type<tc>, window_params = [{transform_indices = @transform_0, window_bounds = array<i64: 2, 4, 2, 128>}, {transform_indices = @transform_1, window_bounds = array<i64: 2, 2, 128>}, {transform_indices = @transform_2, window_bounds = array<i64: 1, 3, 2, 128>}]} {
    %c0_i32 = arith.constant 0 : i32
    %0 = arith.cmpi eq, %arg1, %c0_i32 : i32
    %1 = arith.extui %0 : i1 to i32
    %c0_i32_0 = arith.constant 0 : i32
    %2 = arith.cmpi ne, %1, %c0_i32_0 : i32
    scf.if %2 {
      %cst_99 = arith.constant 0.000000e+00 : f32
      %112 = vector.broadcast %cst_99 : f32 to vector<3x2x128xf32>
      %c0_100 = arith.constant 0 : index
      %c0_101 = arith.constant 0 : index
      %c0_102 = arith.constant 0 : index
      %c0_103 = arith.constant 0 : index
      %113 = vector.load %arg4[%c0_100, %c0_101, %c0_102, %c0_103] : memref<1x3x2x128xf32, #tpu.memory_space<vmem>>, vector<1x3x2x128xf32>
      %114 = vector.shape_cast %113 : vector<1x3x2x128xf32> to vector<3x2x128xf32>
      %115 = vector.shape_cast %112 : vector<3x2x128xf32> to vector<1x3x2x128xf32>
      tpu.vector_store %arg4[%c0_100, %c0_101, %c0_102, %c0_103], %115 {strides = array<i32>} : memref<1x3x2x128xf32, #tpu.memory_space<vmem>>, vector<1x3x2x128xf32>,
    } else {
    }
    %cst = arith.constant 0.000000e+00 : f32
    %3 = vector.broadcast %cst : f32 to vector<2x128xf32>
    %cst_1 = arith.constant 0.000000e+00 : f32
    %4 = vector.broadcast %cst_1 : f32 to vector<2x128xf32>
    %cst_2 = arith.constant 0.000000e+00 : f32
    %5 = vector.broadcast %cst_2 : f32 to vector<2x128xf32>
    %c0 = arith.constant 0 : index
    %c0_3 = arith.constant 0 : index
    %c0_4 = arith.constant 0 : index
    %6 = vector.load %arg3[%c0, %c0_3, %c0_4] : memref<2x2x128xf32, #tpu.memory_space<vmem>>, vector<1x2x128xf32>
    %7 = vector.shape_cast %6 : vector<1x2x128xf32> to vector<2x128xf32>
    %c0_5 = arith.constant 0 : index
    %c0_6 = arith.constant 0 : index
    %c0_7 = arith.constant 0 : index
    %c0_8 = arith.constant 0 : index
    %8 = vector.load %arg2[%c0_5, %c0_6, %c0_7, %c0_8] : memref<2x4x2x128xf32, #tpu.memory_space<vmem>>, vector<1x1x2x128xf32>
    %9 = vector.shape_cast %8 : vector<1x1x2x128xf32> to vector<2x128xf32>
    %c0_9 = arith.constant 0 : index
    %c1 = arith.constant 1 : index
    %c0_10 = arith.constant 0 : index
    %c0_11 = arith.constant 0 : index
    %10 = vector.load %arg2[%c0_9, %c1, %c0_10, %c0_11] : memref<2x4x2x128xf32, #tpu.memory_space<vmem>>, vector<1x1x2x128xf32>
    %11 = vector.shape_cast %10 : vector<1x1x2x128xf32> to vector<2x128xf32>
    %12 = arith.maximumf %9, %11 : vector<2x128xf32>
    %c0_12 = arith.constant 0 : index
    %c2 = arith.constant 2 : index
    %c0_13 = arith.constant 0 : index
    %c0_14 = arith.constant 0 : index
    %13 = vector.load %arg2[%c0_12, %c2, %c0_13, %c0_14] : memref<2x4x2x128xf32, #tpu.memory_space<vmem>>, vector<1x1x2x128xf32>
    %14 = vector.shape_cast %13 : vector<1x1x2x128xf32> to vector<2x128xf32>
    %15 = arith.maximumf %12, %14 : vector<2x128xf32>
    %c0_15 = arith.constant 0 : index
    %c3 = arith.constant 3 : index
    %c0_16 = arith.constant 0 : index
    %c0_17 = arith.constant 0 : index
    %16 = vector.load %arg2[%c0_15, %c3, %c0_16, %c0_17] : memref<2x4x2x128xf32, #tpu.memory_space<vmem>>, vector<1x1x2x128xf32>
    %17 = vector.shape_cast %16 : vector<1x1x2x128xf32> to vector<2x128xf32>
    %18 = arith.maximumf %15, %17 : vector<2x128xf32>
    %c0_18 = arith.constant 0 : index
    %c1_19 = arith.constant 1 : index
    %c0_20 = arith.constant 0 : index
    %c0_21 = arith.constant 0 : index
    %19 = vector.load %arg2[%c0_18, %c1_19, %c0_20, %c0_21] : memref<2x4x2x128xf32, #tpu.memory_space<vmem>>, vector<1x1x2x128xf32>
    %20 = vector.shape_cast %19 : vector<1x1x2x128xf32> to vector<2x128xf32>
    %21 = arith.subf %20, %18 : vector<2x128xf32>
    %22 = math.exp %21 : vector<2x128xf32>
    %c0_22 = arith.constant 0 : index
    %c0_23 = arith.constant 0 : index
    %c0_24 = arith.constant 0 : index
    %c0_25 = arith.constant 0 : index
    %23 = vector.load %arg2[%c0_22, %c0_23, %c0_24, %c0_25] : memref<2x4x2x128xf32, #tpu.memory_space<vmem>>, vector<1x1x2x128xf32>
    %24 = vector.shape_cast %23 : vector<1x1x2x128xf32> to vector<2x128xf32>
    %25 = arith.subf %24, %18 : vector<2x128xf32>
    %26 = math.exp %25 : vector<2x128xf32>
    %27 = arith.addf %22, %26 : vector<2x128xf32>
    %c0_26 = arith.constant 0 : index
    %c2_27 = arith.constant 2 : index
    %c0_28 = arith.constant 0 : index
    %c0_29 = arith.constant 0 : index
    %28 = vector.load %arg2[%c0_26, %c2_27, %c0_28, %c0_29] : memref<2x4x2x128xf32, #tpu.memory_space<vmem>>, vector<1x1x2x128xf32>
    %29 = vector.shape_cast %28 : vector<1x1x2x128xf32> to vector<2x128xf32>
    %30 = arith.subf %29, %18 : vector<2x128xf32>
    %31 = math.exp %30 : vector<2x128xf32>
    %32 = arith.addf %27, %31 : vector<2x128xf32>
    %c0_30 = arith.constant 0 : index
    %c3_31 = arith.constant 3 : index
    %c0_32 = arith.constant 0 : index
    %c0_33 = arith.constant 0 : index
    %33 = vector.load %arg2[%c0_30, %c3_31, %c0_32, %c0_33] : memref<2x4x2x128xf32, #tpu.memory_space<vmem>>, vector<1x1x2x128xf32>
    %34 = vector.shape_cast %33 : vector<1x1x2x128xf32> to vector<2x128xf32>
    %35 = arith.subf %34, %18 : vector<2x128xf32>
    %36 = math.exp %35 : vector<2x128xf32>
    %37 = arith.addf %32, %36 : vector<2x128xf32>
    %38 = tpu.reciprocal %37 : vector<2x128xf32> -> vector<2x128xf32>
    %39 = arith.mulf %22, %38 : vector<2x128xf32>
    %40 = arith.mulf %39, %7 : vector<2x128xf32>
    %41 = vector.shape_cast %40 : vector<2x128xf32> to vector<1x2x128xf32>
    %cst_34 = arith.constant dense<0.000000e+00> : vector<2x128xf32>
    %42 = vector.multi_reduction <add>, %41, %cst_34 [0] : vector<1x2x128xf32> to vector<2x128xf32>
    %43 = arith.addf %3, %42 : vector<2x128xf32>
    %44 = vector.shape_cast %39 : vector<2x128xf32> to vector<1x2x128xf32>
    %cst_35 = arith.constant dense<0.000000e+00> : vector<2x128xf32>
    %45 = vector.multi_reduction <add>, %44, %cst_35 [0] : vector<1x2x128xf32> to vector<2x128xf32>
    %46 = arith.addf %4, %45 : vector<2x128xf32>
    %47 = vector.shape_cast %7 : vector<2x128xf32> to vector<1x2x128xf32>
    %cst_36 = arith.constant dense<0.000000e+00> : vector<2x128xf32>
    %48 = vector.multi_reduction <add>, %47, %cst_36 [0] : vector<1x2x128xf32> to vector<2x128xf32>
    %49 = arith.addf %5, %48 : vector<2x128xf32>
    %c1_37 = arith.constant 1 : index
    %c0_38 = arith.constant 0 : index
    %c0_39 = arith.constant 0 : index
    %50 = vector.load %arg3[%c1_37, %c0_38, %c0_39] : memref<2x2x128xf32, #tpu.memory_space<vmem>>, vector<1x2x128xf32>
    %51 = vector.shape_cast %50 : vector<1x2x128xf32> to vector<2x128xf32>
    %c1_40 = arith.constant 1 : index
    %c0_41 = arith.constant 0 : index
    %c0_42 = arith.constant 0 : index
    %c0_43 = arith.constant 0 : index
    %52 = vector.load %arg2[%c1_40, %c0_41, %c0_42, %c0_43] : memref<2x4x2x128xf32, #tpu.memory_space<vmem>>, vector<1x1x2x128xf32>
    %53 = vector.shape_cast %52 : vector<1x1x2x128xf32> to vector<2x128xf32>
    %c1_44 = arith.constant 1 : index
    %c1_45 = arith.constant 1 : index
    %c0_46 = arith.constant 0 : index
    %c0_47 = arith.constant 0 : index
    %54 = vector.load %arg2[%c1_44, %c1_45, %c0_46, %c0_47] : memref<2x4x2x128xf32, #tpu.memory_space<vmem>>, vector<1x1x2x128xf32>
    %55 = vector.shape_cast %54 : vector<1x1x2x128xf32> to vector<2x128xf32>
    %56 = arith.maximumf %53, %55 : vector<2x128xf32>
    %c1_48 = arith.constant 1 : index
    %c2_49 = arith.constant 2 : index
    %c0_50 = arith.constant 0 : index
    %c0_51 = arith.constant 0 : index
    %57 = vector.load %arg2[%c1_48, %c2_49, %c0_50, %c0_51] : memref<2x4x2x128xf32, #tpu.memory_space<vmem>>, vector<1x1x2x128xf32>
    %58 = vector.shape_cast %57 : vector<1x1x2x128xf32> to vector<2x128xf32>
    %59 = arith.maximumf %56, %58 : vector<2x128xf32>
    %c1_52 = arith.constant 1 : index
    %c3_53 = arith.constant 3 : index
    %c0_54 = arith.constant 0 : index
    %c0_55 = arith.constant 0 : index
    %60 = vector.load %arg2[%c1_52, %c3_53, %c0_54, %c0_55] : memref<2x4x2x128xf32, #tpu.memory_space<vmem>>, vector<1x1x2x128xf32>
    %61 = vector.shape_cast %60 : vector<1x1x2x128xf32> to vector<2x128xf32>
    %62 = arith.maximumf %59, %61 : vector<2x128xf32>
    %c1_56 = arith.constant 1 : index
    %c1_57 = arith.constant 1 : index
    %c0_58 = arith.constant 0 : index
    %c0_59 = arith.constant 0 : index
    %63 = vector.load %arg2[%c1_56, %c1_57, %c0_58, %c0_59] : memref<2x4x2x128xf32, #tpu.memory_space<vmem>>, vector<1x1x2x128xf32>
    %64 = vector.shape_cast %63 : vector<1x1x2x128xf32> to vector<2x128xf32>
    %65 = arith.subf %64, %62 : vector<2x128xf32>
    %66 = math.exp %65 : vector<2x128xf32>
    %c1_60 = arith.constant 1 : index
    %c0_61 = arith.constant 0 : index
    %c0_62 = arith.constant 0 : index
    %c0_63 = arith.constant 0 : index
    %67 = vector.load %arg2[%c1_60, %c0_61, %c0_62, %c0_63] : memref<2x4x2x128xf32, #tpu.memory_space<vmem>>, vector<1x1x2x128xf32>
    %68 = vector.shape_cast %67 : vector<1x1x2x128xf32> to vector<2x128xf32>
    %69 = arith.subf %68, %62 : vector<2x128xf32>
    %70 = math.exp %69 : vector<2x128xf32>
    %71 = arith.addf %66, %70 : vector<2x128xf32>
    %c1_64 = arith.constant 1 : index
    %c2_65 = arith.constant 2 : index
    %c0_66 = arith.constant 0 : index
    %c0_67 = arith.constant 0 : index
    %72 = vector.load %arg2[%c1_64, %c2_65, %c0_66, %c0_67] : memref<2x4x2x128xf32, #tpu.memory_space<vmem>>, vector<1x1x2x128xf32>
    %73 = vector.shape_cast %72 : vector<1x1x2x128xf32> to vector<2x128xf32>
    %74 = arith.subf %73, %62 : vector<2x128xf32>
    %75 = math.exp %74 : vector<2x128xf32>
    %76 = arith.addf %71, %75 : vector<2x128xf32>
    %c1_68 = arith.constant 1 : index
    %c3_69 = arith.constant 3 : index
    %c0_70 = arith.constant 0 : index
    %c0_71 = arith.constant 0 : index
    %77 = vector.load %arg2[%c1_68, %c3_69, %c0_70, %c0_71] : memref<2x4x2x128xf32, #tpu.memory_space<vmem>>, vector<1x1x2x128xf32>
    %78 = vector.shape_cast %77 : vector<1x1x2x128xf32> to vector<2x128xf32>
    %79 = arith.subf %78, %62 : vector<2x128xf32>
    %80 = math.exp %79 : vector<2x128xf32>
    %81 = arith.addf %76, %80 : vector<2x128xf32>
    %82 = tpu.reciprocal %81 : vector<2x128xf32> -> vector<2x128xf32>
    %83 = arith.mulf %66, %82 : vector<2x128xf32>
    %84 = arith.mulf %83, %51 : vector<2x128xf32>
    %85 = vector.shape_cast %84 : vector<2x128xf32> to vector<1x2x128xf32>
    %cst_72 = arith.constant dense<0.000000e+00> : vector<2x128xf32>
    %86 = vector.multi_reduction <add>, %85, %cst_72 [0] : vector<1x2x128xf32> to vector<2x128xf32>
    %87 = arith.addf %43, %86 : vector<2x128xf32>
    %88 = vector.shape_cast %83 : vector<2x128xf32> to vector<1x2x128xf32>
    %cst_73 = arith.constant dense<0.000000e+00> : vector<2x128xf32>
    %89 = vector.multi_reduction <add>, %88, %cst_73 [0] : vector<1x2x128xf32> to vector<2x128xf32>
    %90 = arith.addf %46, %89 : vector<2x128xf32>
    %91 = vector.shape_cast %51 : vector<2x128xf32> to vector<1x2x128xf32>
    %cst_74 = arith.constant dense<0.000000e+00> : vector<2x128xf32>
    %92 = vector.multi_reduction <add>, %91, %cst_74 [0] : vector<1x2x128xf32> to vector<2x128xf32>
    %93 = arith.addf %49, %92 : vector<2x128xf32>
    %c0_75 = arith.constant 0 : index
    %c0_76 = arith.constant 0 : index
    %c0_77 = arith.constant 0 : index
    %c0_78 = arith.constant 0 : index
    %94 = vector.load %arg4[%c0_75, %c0_76, %c0_77, %c0_78] : memref<1x3x2x128xf32, #tpu.memory_space<vmem>>, vector<1x1x2x128xf32>
    %95 = vector.shape_cast %94 : vector<1x1x2x128xf32> to vector<2x128xf32>
    %96 = arith.addf %95, %87 : vector<2x128xf32>
    %c0_79 = arith.constant 0 : index
    %c0_80 = arith.constant 0 : index
    %c0_81 = arith.constant 0 : index
    %c0_82 = arith.constant 0 : index
    %97 = vector.load %arg4[%c0_79, %c0_80, %c0_81, %c0_82] : memref<1x3x2x128xf32, #tpu.memory_space<vmem>>, vector<1x1x2x128xf32>
    %98 = vector.shape_cast %97 : vector<1x1x2x128xf32> to vector<2x128xf32>
    %99 = vector.shape_cast %96 : vector<2x128xf32> to vector<1x1x2x128xf32>
    tpu.vector_store %arg4[%c0_79, %c0_80, %c0_81, %c0_82], %99 {strides = array<i32>} : memref<1x3x2x128xf32, #tpu.memory_space<vmem>>, vector<1x1x2x128xf32>,
    %c0_83 = arith.constant 0 : index
    %c1_84 = arith.constant 1 : index
    %c0_85 = arith.constant 0 : index
    %c0_86 = arith.constant 0 : index
    %100 = vector.load %arg4[%c0_83, %c1_84, %c0_85, %c0_86] : memref<1x3x2x128xf32, #tpu.memory_space<vmem>>, vector<1x1x2x128xf32>
    %101 = vector.shape_cast %100 : vector<1x1x2x128xf32> to vector<2x128xf32>
    %102 = arith.addf %101, %90 : vector<2x128xf32>
    %c0_87 = arith.constant 0 : index
    %c1_88 = arith.constant 1 : index
    %c0_89 = arith.constant 0 : index
    %c0_90 = arith.constant 0 : index
    %103 = vector.load %arg4[%c0_87, %c1_88, %c0_89, %c0_90] : memref<1x3x2x128xf32, #tpu.memory_space<vmem>>, vector<1x1x2x128xf32>
    %104 = vector.shape_cast %103 : vector<1x1x2x128xf32> to vector<2x128xf32>
    %105 = vector.shape_cast %102 : vector<2x128xf32> to vector<1x1x2x128xf32>
    tpu.vector_store %arg4[%c0_87, %c1_88, %c0_89, %c0_90], %105 {strides = array<i32>} : memref<1x3x2x128xf32, #tpu.memory_space<vmem>>, vector<1x1x2x128xf32>,
    %c0_91 = arith.constant 0 : index
    %c2_92 = arith.constant 2 : index
    %c0_93 = arith.constant 0 : index
    %c0_94 = arith.constant 0 : index
    %106 = vector.load %arg4[%c0_91, %c2_92, %c0_93, %c0_94] : memref<1x3x2x128xf32, #tpu.memory_space<vmem>>, vector<1x1x2x128xf32>
    %107 = vector.shape_cast %106 : vector<1x1x2x128xf32> to vector<2x128xf32>
    %108 = arith.addf %107, %93 : vector<2x128xf32>
    %c0_95 = arith.constant 0 : index
    %c2_96 = arith.constant 2 : index
    %c0_97 = arith.constant 0 : index
    %c0_98 = arith.constant 0 : index
    %109 = vector.load %arg4[%c0_95, %c2_96, %c0_97, %c0_98] : memref<1x3x2x128xf32, #tpu.memory_space<vmem>>, vector<1x1x2x128xf32>
    %110 = vector.shape_cast %109 : vector<1x1x2x128xf32> to vector<2x128xf32>
    %111 = vector.shape_cast %108 : vector<2x128xf32> to vector<1x1x2x128xf32>
    tpu.vector_store %arg4[%c0_95, %c2_96, %c0_97, %c0_98], %111 {strides = array<i32>} : memref<1x3x2x128xf32, #tpu.memory_space<vmem>>, vector<1x1x2x128xf32>,
    return
  }
  func.func @transform_0(%arg0: i32, %arg1: i32) -> (i32, i32, i32, i32) {
    %c0_i32 = arith.constant 0 : i32
    %c0_i32_0 = arith.constant 0 : i32
    %c0_i32_1 = arith.constant 0 : i32
    return %arg0, %c0_i32, %arg1, %c0_i32_0 : i32, i32, i32, i32
  }
  func.func @transform_1(%arg0: i32, %arg1: i32) -> (i32, i32, i32) {
    %c0_i32 = arith.constant 0 : i32
    %c0_i32_0 = arith.constant 0 : i32
    return %arg0, %arg1, %c0_i32 : i32, i32, i32
  }
  func.func @transform_2(%arg0: i32, %arg1: i32) -> (i32, i32, i32, i32) {
    %c0_i32 = arith.constant 0 : i32
    %c0_i32_0 = arith.constant 0 : i32
    %c0_i32_1 = arith.constant 0 : i32
    %c0_i32_2 = arith.constant 0 : i32
    return %arg0, %c0_i32, %c0_i32_0, %c0_i32_1 : i32, i32, i32, i32
  }
}

</mosaic_0001>

<bundles_post_ra>
// kernel: tpu_custom_call.1
= control target key start
LH: loop header
LB: loop body
LE: loop exit
PB: predicated region body
PF: predicated region fallthrough
CT: control target
= control target key end

     0   :  { %7 = vsyncpa [#allocation3], 0  ;;  %s283_s0 = inlined_call_operand.hbm [shape: f32[2,4,2,128], index: 0, kind: input, shape index: {}]   ;;  %s284_s1 = inlined_call_operand.hbm [shape: f32[2,2,128], index: 1, kind: input, shape index: {}]   ;;  %s285_s2 = inlined_call_operand.hbm [shape: f32[1,3,2,128], index: 2, kind: output, shape index: {}]  }
   0x1   :  { %8 = vsyncpa [#allocation6], 0 }
   0x2   :  { %9 = vsyncpa [#allocation4], 0  ;;  %s240_s9 = smov [#allocation2]  }
   0x3   :  { %s15_s10 = sshll.u32 %s240_s9, 4  ;;  %s16_s10 = int_to_ptr.vmem [resolvable:$true] %s15_s10 }
   0x4   :  { %s182_s11 = scalar_lea.vmem %s16_s10, 256  ;;  %p187_p1 = scmp.lt.s32.totalorder %s16_s10, %s16_s10 }
   0x5   :  { %p183_p0 = scmp.ne.s32.totalorder %s16_s10, %s182_s11  ;;  %p188_p2 = scmp.lt.s32.totalorder %s182_s11, %s182_s11 }
   0x7   :  { %p189_p3 = por %p188_p2, %p187_p1 }
   0x9   :  { %p190_p4 = pnand %p189_p3, %p183_p0 }
   0xb   :  { %193 = shalt.err (!%p190_p4)
}
   0xc   :  { %s241_s12 = smov 32   ;;  %s242_s13 = smov 2  }
   0xd   :  { %21 = dma.hbm_to_vmem [thread:$0]  %s283_s0, 256, %s16_s10, [#allocation3], %s241_s12, %s241_s12, %s242_s13  }
   0xe   :  { %s243_s16 = smov [#allocation5]  }
   0xf   :  { %s27_s17 = sshll.u32 %s243_s16, 4  ;;  %s28_s17 = int_to_ptr.vmem [resolvable:$true] %s27_s17 }
  0x10   :  { %s202_s18 = scalar_lea.vmem %s28_s17, 64  ;;  %p207_p6 = scmp.lt.s32.totalorder %s28_s17, %s28_s17 }
  0x11   :  { %p203_p5 = scmp.ne.s32.totalorder %s28_s17, %s202_s18  ;;  %p208_p7 = scmp.lt.s32.totalorder %s202_s18, %s202_s18 }
  0x13   :  { %p209_p8 = por %p208_p7, %p207_p6 }
  0x15   :  { %p210_p9 = pnand %p209_p8, %p203_p5 }
  0x17   :  { %213 = shalt.err (!%p210_p9)
}
  0x18   :  { %33 = dma.hbm_to_vmem [thread:$0]  %s284_s1, 64, %s28_s17, [#allocation6], %s241_s12, %s241_s12, %s242_s13  }
  0x19   :  { %234 = dma.done.wait [#allocation3], 256  }
  0x1a   :  { %235 = vsyncadd [#allocation3], 4294967040 }
  0x1b   :  { %236 = dma.done.wait [#allocation6], 64  }
  0x1c   :  { %237 = vsyncadd [#allocation6], 4294967232  ;;  %v244_v0 = vmov 0.0   ;;  %v273_v1 = vld [vmem:[#allocation5] sm:$0x3]  ;;  %s245_s0 = smov [#allocation7]  }
  0x1d   :  { %44 = vst [vmem:[#allocation7] sm:$0x3] %v244_v0  ;;  %45 = vst [vmem:[#allocation7 + $0x2] sm:$0x3] %v244_v0  ;;  %v48_v2 = vld [vmem:[#allocation2] sm:$0x3] }
  0x1e   :  { %46 = vst [vmem:[#allocation7 + $0x4] sm:$0x3] %v244_v0  ;;  %v50_v3 = vld [vmem:[#allocation2 + $0x2] sm:$0x3]  ;;  %v53_v5 = vld [vmem:[#allocation2 + $0x4] sm:$0x3] }
  0x1f   :  { %v51_v4 = vmax.f32 %v48_v2, %v50_v3  ;;  %v56_v6 = vld [vmem:[#allocation2 + $0x6] sm:$0x3]  ;;  %v83_v7 = vld [vmem:[#allocation5 + $0x2] sm:$0x3]  ;;  %v85_v8 = vld [vmem:[#allocation2 + $0x8] sm:$0x3] }
  0x20   :  { %v87_v9 = vld [vmem:[#allocation2 + $0xa] sm:$0x3]  ;;  %v90_v10 = vld [vmem:[#allocation2 + $0xc] sm:$0x3]  ;;  %v118_v11 = vadd.f32 %v83_v7, %v273_v1  ;;  %v93_v17 = vld [vmem:[#allocation2 + $0xe] sm:$0x3] }
  0x21   :  { %v54_v12 = vmax.f32 %v51_v4, %v53_v5  ;;  %v88_v13 = vmax.f32 %v85_v8, %v87_v9  ;;  %s135_s1 = sshll.u32 %s245_s0, 4  ;;  %s136_s1 = int_to_ptr.vmem [resolvable:$true] %s135_s1 }
  0x22   :  { %s214_s21 = scalar_lea.vmem %s136_s1, 96  ;;  %p219_p11 = scmp.lt.s32.totalorder %s136_s1, %s136_s1 }
  0x23   :  { %v57_v15 = vmax.f32 %v54_v12, %v56_v6  ;;  %v91_v16 = vmax.f32 %v88_v13, %v90_v10  ;;  %p215_p10 = scmp.ne.s32.totalorder %s136_s1, %s214_s21  ;;  %p220_p12 = scmp.lt.s32.totalorder %s214_s21, %s214_s21 }
  0x24   :  { %v123_v55 = vld [vmem:[#allocation7 + $0x2] sm:$0x3]  ;;  %v119_v58 = vld [vmem:[#allocation7] sm:$0x3] }
  0x25   :  { %v127_v14 = vld [vmem:[#allocation7 + $0x4] sm:$0x3]  ;;  %v58_v19 = vsub.f32 %v50_v3, %v57_v15  ;;  %v61_v20 = vsub.f32 %v48_v2, %v57_v15  ;;  %v65_v21 = vsub.f32 %v53_v5, %v57_v15  ;;  %v69_v22 = vsub.f32 %v56_v6, %v57_v15  ;;  %p221_p13 = por %p220_p12, %p219_p11 }
  0x26   :  { %v128_v18 = vadd.f32 %v127_v14, %v118_v11  ;;  %v94_v23 = vmax.f32 %v91_v16, %v93_v17 }
  0x27   :  { %v59_v24 = vmul.f32 1.442695, %v58_v19  ;;  %v62_v25 = vmul.f32 1.442695, %v61_v20  ;;  %v66_v26 = vmul.f32 1.442695, %v65_v21  ;;  %p222_p0 = pnand %p221_p13, %p215_p10 }
  0x28   :  { %129 = vst [vmem:[#allocation7 + $0x4] sm:$0x3] %v128_v18  ;;  %v70_v27 = vmul.f32 1.442695, %v69_v22  ;;  %v95_v28 = vsub.f32 %v87_v9, %v94_v23  ;;  %v98_v29 = vsub.f32 %v85_v8, %v94_v23  ;;  %v102_v30 = vsub.f32 %v90_v10, %v94_v23 }
  0x29   :  { %154 = vpow2.f32 %v59_v24  ;;  %v106_v31 = vsub.f32 %v93_v17, %v94_v23 }
  0x2a   :  { %156 = vpow2.f32 %v62_v25  ;;  %v96_v32 = vmul.f32 1.442695, %v95_v28  ;;  %v99_v33 = vmul.f32 1.442695, %v98_v29  ;;  %v103_v34 = vmul.f32 1.442695, %v102_v30 }
  0x2b   :  { %158 = vpow2.f32 %v66_v26  ;;  %v107_v35 = vmul.f32 1.442695, %v106_v31 }
  0x2c   :  { %160 = vpow2.f32 %v70_v27 }
  0x2d   :  { %162 = vpow2.f32 %v96_v32 }
  0x2e   :  { %164 = vpow2.f32 %v99_v33 }
  0x2f   :  { %166 = vpow2.f32 %v103_v34 }
  0x30   :  { %168 = vpow2.f32 %v107_v35 }
  0x36   :  { %v155_v36 = vpop.eup %154 }
  0x37   :  { %v157_v37 = vpop.eup %156 }
  0x38   :  { %v159_v38 = vpop.eup %158  ;;  %v64_v39 = vadd.f32 %v157_v37, %v155_v36 }
  0x39   :  { %v161_v40 = vpop.eup %160 }
  0x3a   :  { %v163_v41 = vpop.eup %162  ;;  %v68_v42 = vadd.f32 %v159_v38, %v64_v39 }
  0x3b   :  { %v165_v43 = vpop.eup %164 }
  0x3c   :  { %v167_v44 = vpop.eup %166  ;;  %v72_v45 = vadd.f32 %v161_v40, %v68_v42  ;;  %v101_v46 = vadd.f32 %v165_v43, %v163_v41 }
  0x3d   :  { %v169_v47 = vpop.eup %168 }
  0x3e   :  { %170 = vrcp.f32 %v72_v45  ;;  %v105_v48 = vadd.f32 %v167_v44, %v101_v46 }
  0x40   :  { %v109_v49 = vadd.f32 %v169_v47, %v105_v48 }
  0x42   :  { %172 = vrcp.f32 %v109_v49 }
  0x4b   :  { %v171_v50 = vpop.eup %170 }
  0x4c   :  { %v74_v51 = vmul.f32 %v171_v50, %v155_v36 }
  0x4e   :  { %v75_v53 = vmul.f32 %v74_v51, %v273_v1 }
  0x4f   :  { %v173_v52 = vpop.eup %172 }
  0x50   :  { %v111_v54 = vmul.f32 %v173_v52, %v163_v41 }
  0x52   :  { %v112_v56 = vmul.f32 %v111_v54, %v83_v7  ;;  %v116_v57 = vadd.f32 %v111_v54, %v74_v51 }
  0x54   :  { %v114_v59 = vadd.f32 %v112_v56, %v75_v53  ;;  %v124_v60 = vadd.f32 %v123_v55, %v116_v57 }
  0x56   :  { %v120_v61 = vadd.f32 %v119_v58, %v114_v59  ;;  %125 = vst [vmem:[#allocation7 + $0x2] sm:$0x3] %v124_v60 }
  0x58   :  { %121 = vst [vmem:[#allocation7] sm:$0x3] %v120_v61 }
  0x59   :  { %225 = shalt.err (!%p222_p0)
}
  0x5a   :  { %141 = dma.vmem_to_hbm [thread:$0]  %s136_s1, 96, %s285_s2, [#allocation4], %s241_s12, %s241_s12, %s242_s13  }
  0x5b   :  { %238 = dma.done.wait [#allocation4], 96  }
  0x5c   :  { %239 = vsyncadd [#allocation4], 4294967200 }
  0x5d   :  { %145 = vsyncpa [#allocation3], 1 }
  0x5e   :  { %146 = vsyncpa [#allocation6], 1 }
  0x5f   :  { %147 = vsyncpa [#allocation4], 1 }

</bundles_post_ra>
